<compile_context>
chip_gen: v6e
topology: v6e:2x2x1
jax: 0.10.0
libtpu: 0.0.40
codegen_flags: <defaults>
</compile_context>

<pallas_src>
import functools
import math

import jax
import jax.numpy as jnp
from jax import lax
from jax.experimental import pallas as pl
from jax.experimental.pallas import tpu as pltpu


# ---------------------------------------------------------------------------
# Kernel: one batch tile (tb elements) per grid step, processed in fixed
# tb_chunk sub-tiles:  center -> (rotation folded into layer-1 tables, two
# VPU FMAs, f32) -> ReLU -> one (chunk_rows, H)x(H, H) MXU matmul (f32 acc)
# -> bias -> lane-dense store.
# ---------------------------------------------------------------------------
def _embed_centroidal_kernel(x_ref, a0_ref, a1_ref, b1_ref, w2_ref, b2_ref,
                             y_ref, *, cn, n, h, tb_chunk, n_chunks, flat_out):
    rows = cn * n
    mm_dtype = w2_ref.dtype

    # Resident operands: load once per grid step, hoisted out of the chunk loop.
    a0 = a0_ref[...].reshape(1, cn, 1, h)        # (R_g^T W1)[0]  (f32)
    a1 = a1_ref[...].reshape(1, cn, 1, h)        # (R_g^T W1)[1]  (f32)
    b1 = b1_ref[...].reshape(1, 1, 1, h)         # (f32)
    w2 = w2_ref[...]                             # (H, H) in matmul dtype
    b2 = b2_ref[...].astype(jnp.float32)         # (1, H)

    def chunk(c, carry):
        b0 = c * tb_chunk
        if not isinstance(b0, int):
            b0 = pl.multiple_of(b0, tb_chunk)

        # Centering over the original N points (identical to centering over the
        # cn*N replicated points).  NOTE: like the PyTorch reference, the
        # centroid ignores `mask` — intentional fidelity to the module.
        x = x_ref[pl.ds(b0, tb_chunk), :, :]                     # (tbc, N, 2) f32
        xc = x - jnp.mean(x, axis=1, keepdims=True)

        # Layer 1 with the cn rotations folded into A0/A1: two broadcast FMAs
        # on the VPU, kept in f32 (v5e has no bf16 VALUs; free on v6e/v7x).
        x0 = xc[:, None, :, 0:1]                                 # (tbc, 1, N, 1)
        x1 = xc[:, None, :, 1:2]
        hidden = jnp.maximum(x0 * a0 + x1 * a1 + b1, 0.0)        # (tbc, cn, N, H)

        # Layer 2: one MXU matmul per chunk, f32 accumulation.  Cast to the
        # matmul dtype only at the dot (v5e-safe bf16 usage).
        y = jnp.dot(hidden.reshape(tb_chunk * rows, h).astype(mm_dtype), w2,
                    preferred_element_type=jnp.float32)
        y = y + b2                                               # (tbc*rows, H)

        if flat_out:
            y_ref[pl.ds(b0, tb_chunk), :] = (
                y.reshape(tb_chunk, rows * h).astype(y_ref.dtype))
        else:
            y_ref[pl.ds(b0, tb_chunk), :, :] = (
                y.reshape(tb_chunk, rows, h).astype(y_ref.dtype))
        return carry

    if n_chunks == 1:
        chunk(0, None)
    else:
        lax.fori_loop(0, n_chunks, chunk, None, unroll=(n_chunks <= 8))


# ---------------------------------------------------------------------------
# Tile sizing: target ~target_out_bytes of output written per grid step,
# bounded by a VMEM budget that counts double-buffered I/O, resident weights
# AND the in-kernel temporaries; keep >= 4 grid steps when bs allows (2 per
# TensorCore on 2-TC parts) and snap TB toward a balanced multiple of the
# in-kernel chunk size.
# ---------------------------------------------------------------------------
def _choose_tile(bs, n, cn, h, out_itemsize, mm_itemsize, *,
                 target_out_bytes, chunk_rows, vmem_budget_bytes):
    rows = cn * n
    in_b = n * 2 * 4                          # un-replicated (N, 2) f32 / batch elt
    out_b = rows * h * out_itemsize           # (cn*N, H) output / batch elt

    # Fixed MXU M-chunk (bounds the live hidden / f32-accumulator temporaries).
    tb_chunk = max(1, chunk_rows // rows)

    # Resident operands (conservatively x2 for Pallas double buffering).
    wbytes = 2 * (2 * cn * h * 4 + 2 * h * 4 + h * h * mm_itemsize)
    # In-kernel temporaries per chunk: hidden f32 + hidden in mm dtype + y f32.
    tmp_bytes = tb_chunk * rows * h * (4 + mm_itemsize + 4)

    avail = max(vmem_budget_bytes - wbytes - tmp_bytes, 2 * (in_b + out_b))
    tb_cap = max(1, avail // (2 * (in_b + out_b)))          # double-buffered I/O
    tb_target = max(1, pl.cdiv(target_out_bytes, out_b))    # >= target bytes/step
    tb = max(1, min(bs, tb_cap, tb_target))

    # >= 4 grid steps when possible (2 per TC on v7x), >= 2 otherwise; never
    # drop below one full chunk per step.  Harmless on single-TC v5e/v6e.
    min_steps = 4 if bs >= 4 else (2 if bs >= 2 else 1)
    tb = min(tb, max(tb_chunk, pl.cdiv(bs, min_steps)))

    # tb must be a whole number of chunks.
    if tb <= tb_chunk:
        tb_chunk = tb
    else:
        tb = (tb // tb_chunk) * tb_chunk

    # Prefer balanced blocks (minimizes padded / garbage batch rows).
    n_blocks = pl.cdiv(bs, tb)
    tb_bal = pl.cdiv(pl.cdiv(bs, n_blocks), tb_chunk) * tb_chunk
    tb = min(tb, tb_bal)
    return int(tb), int(tb_chunk)


def embed_centroidal(X, mask, params, cn, *,
                     matmul_dtype=jnp.float32,     # bf16 recommended on v6e/v7x
                     out_dtype=jnp.float32,        # bf16 halves write traffic
                     target_out_bytes=4 << 20,
                     chunk_rows=1024,
                     vmem_budget_bytes=24 << 20):
    """Pallas-backed Embed.forward for content_type='centroidal'."""
    bs, n, d = X.shape
    assert d == 2, "centroidal content type forces dim_input = 2"
    h = params["w2"].shape[0]
    rows = cn * n

    # ---- lift glue (pure JAX layout work, matches the torch group-major cat) --
    X_rep = jnp.broadcast_to(X[:, None], (bs, cn, n, 2)).reshape(bs, rows, 2)
    grp = jnp.arange(cn, dtype=X.dtype)
    g_col = jnp.broadcast_to(grp[None, :, None, None],
                             (bs, cn, n, 1)).reshape(bs, rows, 1)
    X_lift = jnp.concatenate([X_rep, g_col], axis=-1)          # (bs, cn*N, 3)
    mask_lift = jnp.tile(mask, (1, cn))                        # (bs, cn*N)

    # ---- fold the cn rotations into the first-layer weights (host, f32) -----
    # angle_g = -2*pi*g/cn  (matches matrixify(-X_lift) in the reference)
    angles = -2.0 * math.pi * jnp.arange(cn, dtype=jnp.float32) / float(cn)
    c = jnp.cos(angles)[:, None]                               # (cn, 1)
    s = jnp.sin(angles)[:, None]
    w1 = params["w1"].astype(jnp.float32)                      # (2, H)
    a0 = c * w1[0][None, :] + s * w1[1][None, :]               # (cn, H)
    a1 = -s * w1[0][None, :] + c * w1[1][None, :]              # (cn, H)
    b1 = params["b1"].astype(jnp.float32)                      # (1, H)
    w2 = params["w2"].astype(matmul_dtype)                     # (H, H)
    b2 = params["b2"].astype(jnp.float32)                      # (1, H)

    # ---- tiling --------------------------------------------------------------
    out_itemsize = jnp.dtype(out_dtype).itemsize
    mm_itemsize = jnp.dtype(matmul_dtype).itemsize
    tb, tb_chunk = _choose_tile(bs, n, cn, h, out_itemsize, mm_itemsize,
                                target_out_bytes=target_out_bytes,
                                chunk_rows=chunk_rows,
                                vmem_budget_bytes=vmem_budget_bytes)
    n_chunks = tb // tb_chunk
    n_blocks = pl.cdiv(bs, tb)
    bs_p = n_blocks * tb

    # Pad only the small un-replicated (bs, N, 2) input (no cn-fold copy).
    X_in = X.astype(jnp.float32)
    if bs_p != bs:
        X_in = jnp.concatenate(
            [X_in, jnp.zeros((bs_p - bs, n, 2), jnp.float32)], axis=0)

    # Lane-dense output slab for H not a multiple of 128.
    flat_out = ((h % 128 != 0) and ((rows * h) % 128 == 0)
                and (n_blocks == 1 or tb % 8 == 0))
    if flat_out:
        out_shape = jax.ShapeDtypeStruct((bs_p, rows * h), out_dtype)
        out_spec = pl.BlockSpec((tb, rows * h), lambda b: (b, 0))
    else:
        out_shape = jax.ShapeDtypeStruct((bs_p, rows, h), out_dtype)
        out_spec = pl.BlockSpec((tb, rows, h), lambda b: (b, 0, 0))

    weight_bytes = (2 * cn * h + 3 * h) * 4 + h * h * mm_itemsize
    cost = pl.CostEstimate(
        flops=2 * bs_p * rows * h * h + 5 * bs_p * rows * h,
        transcendentals=0,
        bytes_accessed=(bs_p * n * 2 * 4
                        + bs_p * rows * h * out_itemsize
                        + weight_bytes))

    y = pl.pallas_call(
        functools.partial(_embed_centroidal_kernel, cn=cn, n=n, h=h,
                          tb_chunk=tb_chunk, n_chunks=n_chunks,
                          flat_out=flat_out),
        out_shape=out_shape,
        grid=(n_blocks,),
        in_specs=[
            pl.BlockSpec((tb, n, 2), lambda b: (b, 0, 0)),   # un-replicated X
            pl.BlockSpec((cn, h), lambda b: (0, 0)),         # A0 (rot-folded W1 row 0)
            pl.BlockSpec((cn, h), lambda b: (0, 0)),         # A1 (rot-folded W1 row 1)
            pl.BlockSpec((1, h), lambda b: (0, 0)),          # b1
            pl.BlockSpec((h, h), lambda b: (0, 0)),          # W2
            pl.BlockSpec((1, h), lambda b: (0, 0)),          # b2
        ],
        out_specs=out_spec,
        compiler_params=pltpu.CompilerParams(
            dimension_semantics=("parallel",),
            vmem_limit_bytes=int(min(vmem_budget_bytes + (8 << 20), 64 << 20))),
        cost_estimate=cost,
    )(X_in, a0, a1, b1, w2, b2)

    if flat_out:
        y = y.reshape(bs_p, rows, h)
    Y_lift = y[:bs] if bs_p != bs else y
    return X_lift, Y_lift, mask_lift


# ---------------------------------------------------------------------------
# Pure-JAX reference (mirrors the PyTorch forward) for sanity checks.
# ---------------------------------------------------------------------------
def embed_centroidal_ref(X, mask, params, cn):
    bs, n, _ = X.shape
    X_c = X - jnp.mean(X, axis=1, keepdims=True)                 # (bs, N, 2)
    angles = -2.0 * math.pi * jnp.arange(cn, dtype=jnp.float32) / float(cn)
    c, s = jnp.cos(angles), jnp.sin(angles)                      # (cn,)
    rx = c[None, :, None, None] * X_c[:, None, :, 0:1] \
        - s[None, :, None, None] * X_c[:, None, :, 1:2]          # (bs, cn, N, 1)
    ry = s[None, :, None, None] * X_c[:, None, :, 0:1] \
        + c[None, :, None, None] * X_c[:, None, :, 1:2]
    rot = jnp.concatenate([rx, ry], axis=-1).reshape(bs, cn * n, 2)
    hdn = jnp.maximum(rot @ params["w1"] + params["b1"], 0.0)
    return hdn @ params["w2"] + params["b2"]


def init_params(key, dim_hidden):
    k1, k2, k3, k4 = jax.random.split(key, 4)
    s1 = 1.0 / math.sqrt(2.0)
    s2 = 1.0 / math.sqrt(dim_hidden)
    return {
        "w1": s1 * jax.random.normal(k1, (2, dim_hidden), jnp.float32),
        "b1": s1 * jax.random.normal(k2, (1, dim_hidden), jnp.float32),
        "w2": s2 * jax.random.normal(k3, (dim_hidden, dim_hidden), jnp.float32),
        "b2": s2 * jax.random.normal(k4, (1, dim_hidden), jnp.float32),
    }


if __name__ == "__main__":
    # Small shapes consistent with the module: bs=2, num_pairs=8, location
    # dim=2, cyclic group cn=4, dim_hidden=128 (lane-dense output).
    bs, n, cn, hidden = 2, 8, 4, 128
    key = jax.random.PRNGKey(0)
    kx, km, kp = jax.random.split(key, 3)

    X = jax.random.normal(kx, (bs, n, 2), jnp.float32)
    mask = (jax.random.uniform(km, (bs, n)) > 0.2).astype(jnp.float32)
    params = init_params(kp, hidden)

    X_lift, Y_lift, mask_lift = embed_centroidal(X, mask, params, cn)
    jax.block_until_ready((X_lift, Y_lift, mask_lift))

    assert X_lift.shape == (bs, cn * n, 3)
    assert Y_lift.shape == (bs, cn * n, hidden)
    assert mask_lift.shape == (bs, cn * n)

    # numerical check against the pure-JAX reference (f32 path)
    Y_ref = embed_centroidal_ref(X, mask, params, cn)
    assert jnp.allclose(Y_lift, Y_ref, atol=1e-3, rtol=1e-3)

    # glue matches the torch layout (group-major tiling, group index appended)
    assert jnp.allclose(X_lift[:, n:2 * n, :2], X)
    assert jnp.allclose(X_lift[:, n:2 * n, 2], jnp.ones((bs, n)))
    assert jnp.allclose(mask_lift[:, (cn - 1) * n:], mask)

    # hidden not a multiple of 128 -> flattened lane-dense output path
    params32 = init_params(kp, 32)
    _, Y32, _ = embed_centroidal(X, mask, params32, cn)
    assert Y32.shape == (bs, cn * n, 32)
    assert jnp.allclose(Y32, embed_centroidal_ref(X, mask, params32, cn),
                        atol=1e-3, rtol=1e-3)

    # bf16 W2 matmul (recommended default on v6e/v7x); layer-1 FMAs stay f32
    _, Ybf, _ = embed_centroidal(X, mask, params, cn,
                                 matmul_dtype=jnp.bfloat16)
    assert jnp.allclose(Ybf, Y_ref, atol=3e-2, rtol=3e-2)

    # bf16 output (halves the dominant HBM write traffic if downstream allows)
    _, Ybo, _ = embed_centroidal(X, mask, params, cn,
                                 matmul_dtype=jnp.bfloat16,
                                 out_dtype=jnp.bfloat16)
    assert Ybo.dtype == jnp.bfloat16
    assert jnp.allclose(Ybo.astype(jnp.float32), Y_ref, atol=3e-2, rtol=3e-2)

    # ragged larger batch: multi-block grid + in-kernel chunk loop + padding
    bs2 = 37
    X2 = jax.random.normal(jax.random.PRNGKey(1), (bs2, n, 2), jnp.float32)
    m2 = jnp.ones((bs2, n), jnp.float32)
    _, Y2, _ = embed_centroidal(X2, m2, params, cn, chunk_rows=128)
    assert Y2.shape == (bs2, cn * n, hidden)
    assert jnp.allclose(Y2, embed_centroidal_ref(X2, m2, params, cn),
                        atol=1e-3, rtol=1e-3)

    print("KERNEL_OK")
</pallas_src>

<mosaic_0001>
module attributes {stable_mosaic.version = 11 : i64} {
  func.func @_embed_centroidal_kernel(%arg0: i32, %arg1: memref<2x8x2xf32, #tpu.memory_space<vmem>>, %arg2: memref<4x128xf32, #tpu.memory_space<vmem>>, %arg3: memref<4x128xf32, #tpu.memory_space<vmem>>, %arg4: memref<1x128xf32, #tpu.memory_space<vmem>>, %arg5: memref<128x128xf32, #tpu.memory_space<vmem>>, %arg6: memref<1x128xf32, #tpu.memory_space<vmem>>, %arg7: memref<2x32x128xf32, #tpu.memory_space<vmem>>) attributes {dimension_semantics = [#tpu.dimension_semantics<parallel>], iteration_bounds = array<i64: 1>, scalar_prefetch = 0 : i64, scratch_operands = 0 : i64, tpu.core_type = #tpu.core_type<tc>, window_params = [{transform_indices = @transform_0, window_bounds = array<i64: 2, 8, 2>}, {pipeline_mode = #tpu.pipeline_mode<synchronous>, transform_indices = @transform_1, window_bounds = array<i64: 4, 128>}, {pipeline_mode = #tpu.pipeline_mode<synchronous>, transform_indices = @transform_2, window_bounds = array<i64: 4, 128>}, {pipeline_mode = #tpu.pipeline_mode<synchronous>, transform_indices = @transform_3, window_bounds = array<i64: 1, 128>}, {pipeline_mode = #tpu.pipeline_mode<synchronous>, transform_indices = @transform_4, window_bounds = array<i64: 128, 128>}, {pipeline_mode = #tpu.pipeline_mode<synchronous>, transform_indices = @transform_5, window_bounds = array<i64: 1, 128>}, {transform_indices = @transform_6, window_bounds = array<i64: 2, 32, 128>}]} {
    %c0 = arith.constant 0 : index
    %c0_0 = arith.constant 0 : index
    %0 = vector.load %arg2[%c0, %c0_0] : memref<4x128xf32, #tpu.memory_space<vmem>>, vector<4x128xf32>
    %1 = vector.shape_cast %0 : vector<4x128xf32> to vector<1x4x1x128xf32>
    %c0_1 = arith.constant 0 : index
    %c0_2 = arith.constant 0 : index
    %2 = vector.load %arg3[%c0_1, %c0_2] : memref<4x128xf32, #tpu.memory_space<vmem>>, vector<4x128xf32>
    %3 = vector.shape_cast %2 : vector<4x128xf32> to vector<1x4x1x128xf32>
    %c0_3 = arith.constant 0 : index
    %c0_4 = arith.constant 0 : index
    %4 = vector.load %arg4[%c0_3, %c0_4] : memref<1x128xf32, #tpu.memory_space<vmem>>, vector<1x128xf32>
    %5 = vector.shape_cast %4 : vector<1x128xf32> to vector<1x1x1x128xf32>
    %c0_5 = arith.constant 0 : index
    %c0_6 = arith.constant 0 : index
    %6 = vector.load %arg5[%c0_5, %c0_6] : memref<128x128xf32, #tpu.memory_space<vmem>>, vector<128x128xf32>
    %c0_7 = arith.constant 0 : index
    %c0_8 = arith.constant 0 : index
    %7 = vector.load %arg6[%c0_7, %c0_8] : memref<1x128xf32, #tpu.memory_space<vmem>>, vector<1x128xf32>
    %c0_9 = arith.constant 0 : index
    %c0_10 = arith.constant 0 : index
    %c0_11 = arith.constant 0 : index
    %8 = vector.load %arg1[%c0_9, %c0_10, %c0_11] : memref<2x8x2xf32, #tpu.memory_space<vmem>>, vector<2x8x2xf32>
    %cst = arith.constant dense<0.000000e+00> : vector<2x2xf32>
    %9 = vector.multi_reduction <add>, %8, %cst [1] : vector<2x8x2xf32> to vector<2x2xf32>
    %10 = vector.shape_cast %9 : vector<2x2xf32> to vector<2x1x2xf32>
    %cst_12 = arith.constant 8.000000e+00 : f32
    %11 = vector.broadcast %cst_12 : f32 to vector<2x1x2xf32>
    %12 = arith.divf %10, %11 : vector<2x1x2xf32>
    %13 = vector.broadcast %12 : vector<2x1x2xf32> to vector<2x8x2xf32>
    %14 = arith.subf %8, %13 : vector<2x8x2xf32>
    %15 = vector.extract_strided_slice %14 {offsets = [0, 0, 0], sizes = [2, 8, 1], strides = [1, 1, 1]} : vector<2x8x2xf32> to vector<2x8x1xf32>
    %16 = vector.shape_cast %15 : vector<2x8x1xf32> to vector<2x1x8x1xf32>
    %17 = vector.extract_strided_slice %14 {offsets = [0, 0, 1], sizes = [2, 8, 1], strides = [1, 1, 1]} : vector<2x8x2xf32> to vector<2x8x1xf32>
    %18 = vector.shape_cast %17 : vector<2x8x1xf32> to vector<2x1x8x1xf32>
    %19 = vector.broadcast %16 : vector<2x1x8x1xf32> to vector<2x4x8x128xf32>
    %20 = vector.broadcast %1 : vector<1x4x1x128xf32> to vector<2x4x8x128xf32>
    %21 = arith.mulf %19, %20 : vector<2x4x8x128xf32>
    %22 = vector.broadcast %18 : vector<2x1x8x1xf32> to vector<2x4x8x128xf32>
    %23 = vector.broadcast %3 : vector<1x4x1x128xf32> to vector<2x4x8x128xf32>
    %24 = arith.mulf %22, %23 : vector<2x4x8x128xf32>
    %25 = arith.addf %21, %24 : vector<2x4x8x128xf32>
    %26 = vector.broadcast %5 : vector<1x1x1x128xf32> to vector<2x4x8x128xf32>
    %27 = arith.addf %25, %26 : vector<2x4x8x128xf32>
    %cst_13 = arith.constant 0.000000e+00 : f32
    %28 = vector.broadcast %cst_13 : f32 to vector<2x4x8x128xf32>
    %29 = arith.maximumf %27, %28 : vector<2x4x8x128xf32>
    %30 = vector.shape_cast %29 : vector<2x4x8x128xf32> to vector<64x128xf32>
    %cst_14 = arith.constant dense<0.000000e+00> : vector<64x128xf32>
    %31 = tpu.matmul %30, %6, %cst_14 {dimension_numbers = #tpu.dot_dimension_numbers<[1], [0], [0], [1], [0, 0, 1, 1], [], []>} : vector<64x128xf32>, vector<128x128xf32>, vector<64x128xf32> -> vector<64x128xf32>
    %32 = vector.broadcast %7 : vector<1x128xf32> to vector<64x128xf32>
    %33 = arith.addf %31, %32 : vector<64x128xf32>
    %34 = vector.shape_cast %33 : vector<64x128xf32> to vector<2x32x128xf32>
    %c0_15 = arith.constant 0 : index
    %c0_16 = arith.constant 0 : index
    %c0_17 = arith.constant 0 : index
    %35 = vector.load %arg7[%c0_15, %c0_16, %c0_17] : memref<2x32x128xf32, #tpu.memory_space<vmem>>, vector<2x32x128xf32>
    tpu.vector_store %arg7[%c0_15, %c0_16, %c0_17], %34 {strides = array<i32>} : memref<2x32x128xf32, #tpu.memory_space<vmem>>, vector<2x32x128xf32>,
    return
  }
  func.func @transform_0(%arg0: i32) -> (i32, i32, i32) {
    %c0_i32 = arith.constant 0 : i32
    %c0_i32_0 = arith.constant 0 : i32
    %c0_i32_1 = arith.constant 0 : i32
    return %arg0, %c0_i32, %c0_i32_0 : i32, i32, i32
  }
  func.func @transform_1(%arg0: i32) -> (i32, i32) {
    %c0_i32 = arith.constant 0 : i32
    %c0_i32_0 = arith.constant 0 : i32
    %c0_i32_1 = arith.constant 0 : i32
    return %c0_i32, %c0_i32_0 : i32, i32
  }
  func.func @transform_2(%arg0: i32) -> (i32, i32) {
    %c0_i32 = arith.constant 0 : i32
    %c0_i32_0 = arith.constant 0 : i32
    %c0_i32_1 = arith.constant 0 : i32
    return %c0_i32, %c0_i32_0 : i32, i32
  }
  func.func @transform_3(%arg0: i32) -> (i32, i32) {
    %c0_i32 = arith.constant 0 : i32
    %c0_i32_0 = arith.constant 0 : i32
    %c0_i32_1 = arith.constant 0 : i32
    return %c0_i32, %c0_i32_0 : i32, i32
  }
  func.func @transform_4(%arg0: i32) -> (i32, i32) {
    %c0_i32 = arith.constant 0 : i32
    %c0_i32_0 = arith.constant 0 : i32
    %c0_i32_1 = arith.constant 0 : i32
    return %c0_i32, %c0_i32_0 : i32, i32
  }
  func.func @transform_5(%arg0: i32) -> (i32, i32) {
    %c0_i32 = arith.constant 0 : i32
    %c0_i32_0 = arith.constant 0 : i32
    %c0_i32_1 = arith.constant 0 : i32
    return %c0_i32, %c0_i32_0 : i32, i32
  }
  func.func @transform_6(%arg0: i32) -> (i32, i32, i32) {
    %c0_i32 = arith.constant 0 : i32
    %c0_i32_0 = arith.constant 0 : i32
    %c0_i32_1 = arith.constant 0 : i32
    return %arg0, %c0_i32, %c0_i32_0 : i32, i32, i32
  }
}

</mosaic_0001>

<bundles_post_ra>
// kernel: tpu_custom_call.1
= control target key start
LH: loop header
LB: loop body
LE: loop exit
PB: predicated region body
PF: predicated region fallthrough
CT: control target
= control target key end

     0   :  { %11 = vsyncpa [#allocation3], 0  ;;  %s606_s0 = inlined_call_operand.vmem [shape: f32[2,8,2], index: 0, kind: input, shape index: {}]   ;;  %s607_s1 = inlined_call_operand.vmem [shape: f32[4,128], index: 1, kind: input, shape index: {}]   ;;  %s608_s2 = inlined_call_operand.vmem [shape: f32[4,128], index: 2, kind: input, shape index: {}]   ;;  %s609_s3 = inlined_call_operand.vmem [shape: f32[1,128], index: 3, kind: input, shape index: {}]   ;;  %s610_s4 = inlined_call_operand.hbm [shape: f32[128,128], index: 4, kind: input, shape index: {}]   ;;  %s611_s5 = inlined_call_operand.vmem [shape: f32[1,128], index: 5, kind: input, shape index: {}]   ;;  %s612_s6 = inlined_call_operand.hbm [shape: f32[2,32,128], index: 6, kind: output, shape index: {}]  }
   0x1   :  { %12 = vsyncpa [#allocation4], 0  ;;  %s528_s21 = smov [#allocation2]  }
   0x2   :  { %s26_s22 = sshll.u32 %s528_s21, 4  ;;  %s27_s22 = int_to_ptr.vmem [resolvable:$true] %s26_s22 }
   0x3   :  { %s492_s23 = scalar_lea.vmem %s27_s22, 2048  ;;  %p497_p1 = scmp.lt.s32.totalorder %s27_s22, %s27_s22 }
   0x4   :  { %p493_p0 = scmp.ne.s32.totalorder %s27_s22, %s492_s23  ;;  %p498_p2 = scmp.lt.s32.totalorder %s492_s23, %s492_s23 }
   0x6   :  { %p499_p3 = por %p498_p2, %p497_p1 }
   0x8   :  { %p500_p4 = pnand %p499_p3, %p493_p0 }
   0xa   :  { %503 = shalt.err (!%p500_p4)
}
   0xb   :  { %s529_s24 = smov 128   ;;  %s530_s25 = smov 8  }
   0xc   :  { %32 = dma.hbm_to_vmem [thread:$0]  %s610_s4, 2048, %s27_s22, [#allocation3], %s529_s24, %s529_s24, %s530_s25  }
   0xd   :  { %524 = dma.done.wait [#allocation3], 2048  }
   0xe   :  { %525 = vsyncadd [#allocation3], 4294965248  ;;  %v531_v0 = vmov 1   ;;  %v532_v1 = vmov 0   ;;  %vm110_vm0 = vcmask 15360   ;;  %v108_v2 = vld [vmem:[%s606_s0] sm:$0xff]  ;;  %v51_v40 = vlaneseq }
   0xf   :  { %482 = vset.pattern.permute.xlu1 %v531_v0  ;;  %481 = vset.pattern.permute.xlu0 %v532_v1  ;;  %v583_v3 = vld [vmem:[%s606_s0 + $0x8] sm:$0xff]  ;;  %v106_v4 = vld [vmem:[#allocation2 + $0x78] sm:$0xff]  ;;  %v111_v5 = vsel %vm110_vm0, %v108_v2, 0.0  ;;  %v105_v7 = vld [vmem:[#allocation2 + $0x70] sm:$0xff]  ;;  %v533_v38 = vmov 1966171168  }
  0x10   :  { %v118_v6 = vsel %vm110_vm0, %v583_v3, 0.0  ;;  %398 = vmatprep.subr.mxu0 %v106_v4  ;;  %442 = vmatprep.subr.mxu1 %v106_v4  ;;  %v112_v8 = vrot.slane %v111_v5, 4  ;;  %v104_v10 = vld [vmem:[#allocation2 + $0x68] sm:$0xff]  ;;  %v103_v13 = vld [vmem:[#allocation2 + $0x60] sm:$0xff]  ;;  %v102_v16 = vld [vmem:[#allocation2 + $0x58] sm:$0xff]  ;;  %v49_v39 = vunpack.c.l.s4 %v533_v38  ;;  %v52_v42 = vshrl.u32 %v51_v40, 7 }
  0x11   :  { %v119_v9 = vrot.slane %v118_v6, 4  ;;  %399 = vmatpush3.msra.mxu0 %v106_v4  ;;  %458 = vmatpush3.msra.mxu1 %v106_v4  ;;  %v101_v19 = vld [vmem:[#allocation2 + $0x50] sm:$0xff]  ;;  %v100_v22 = vld [vmem:[#allocation2 + $0x48] sm:$0xff]  ;;  %v99_v25 = vld [vmem:[#allocation2 + $0x40] sm:$0xff]  ;;  %s534_s11 = smov [#allocation5]  }
  0x12   :  { %400 = vmatprep.subr.mxu0 %v105_v7  ;;  %443 = vmatprep.subr.mxu1 %v105_v7  ;;  %v113_v11 = vadd.f32 %v112_v8, %v111_v5  ;;  %v98_v28 = vld [vmem:[#allocation2 + $0x38] sm:$0xff]  ;;  %v97_v30 = vld [vmem:[#allocation2 + $0x30] sm:$0xff]  ;;  %v96_v32 = vld [vmem:[#allocation2 + $0x28] sm:$0xff]  ;;  %v50_v41 = vunpack.c.0.s8 %v49_v39  ;;  %v142_v52 = vsub.s32 0, %v52_v42  ;;  %s358_s12 = sshll.u32 %s534_s11, 4  ;;  %s359_s12 = int_to_ptr.vmem [resolvable:$true] %s358_s12 }
  0x13   :  { %v120_v12 = vadd.f32 %v119_v9, %v118_v6  ;;  %401 = vmatpush3.msra.mxu0 %v105_v7  ;;  %459 = vmatpush3.msra.mxu1 %v105_v7  ;;  %v95_v33 = vld [vmem:[#allocation2 + $0x20] sm:$0xff]  ;;  %v94_v34 = vld [vmem:[#allocation2 + $0x18] sm:$0xff]  ;;  %v93_v35 = vld [vmem:[#allocation2 + $0x10] sm:$0xff]  ;;  %p509_p6 = scmp.lt.s32.totalorder %s359_s12, %s359_s12 }
  0x14   :  { %402 = vmatprep.subr.mxu0 %v104_v10  ;;  %444 = vmatprep.subr.mxu1 %v104_v10  ;;  %v114_v14 = vrot.slane %v113_v11, 2  ;;  %v92_v36 = vld [vmem:[#allocation2 + $0x8] sm:$0xff]  ;;  %v91_v37 = vld [vmem:[#allocation2] sm:$0xff]  ;;  %v53_v45 = vsub.s32 %v50_v41, %v52_v42 }
  0x15   :  { %v121_v15 = vrot.slane %v120_v12, 2  ;;  %403 = vmatpush3.msra.mxu0 %v104_v10  ;;  %460 = vmatpush3.msra.mxu1 %v104_v10  ;;  %v371_v43 = vld.sshfl [vmem:[%s608_s2] sm:$0x33 pattern:$0x75316420] }
  0x16   :  { %404 = vmatprep.subr.mxu0 %v103_v13  ;;  %445 = vmatprep.subr.mxu1 %v103_v13  ;;  %v115_v17 = vadd.f32 %v114_v14, %v113_v11  ;;  %v370_v44 = vld.sshfl [vmem:[%s607_s1] sm:$0x33 pattern:$0x75316420]  ;;  %v73_v46 = vcombine.high %v371_v43, %v371_v43  ;;  %v80_v48 = vrot.slane %v371_v43, %v53_v45 }
  0x17   :  { %v122_v18 = vadd.f32 %v121_v15, %v120_v12  ;;  %405 = vmatpush3.msra.mxu0 %v103_v13  ;;  %461 = vmatpush3.msra.mxu1 %v103_v13  ;;  %v47_v47 = vcombine.high %v370_v44, %v370_v44  ;;  %v54_v50 = vrot.slane %v370_v44, %v53_v45  ;;  %v372_v14 = vld [vmem:[%s609_s3] ss:$0 sm:$0xff] }
  0x18   :  { %406 = vmatprep.subr.mxu0 %v102_v16  ;;  %446 = vmatprep.subr.mxu1 %v102_v16  ;;  %v116_v20 = vrot.slane %v115_v17, 1  ;;  %v87_v49 = vrot.slane %v73_v46, %v53_v45  ;;  %v88_v53 = vcombine.high %v80_v48, %v80_v48  ;;  %v179_v61 = vrot.slane %v80_v48, %v142_v52  ;;  %v373_v46 = vld [vmem:[%s611_s5] ss:$0 sm:$0xff]  ;;  %s504_s5 = scalar_lea.vmem %s359_s12, 1024 }
  0x19   :  { %v123_v21 = vrot.slane %v122_v18, 1  ;;  %407 = vmatpush3.msra.mxu0 %v102_v16  ;;  %462 = vmatpush3.msra.mxu1 %v102_v16  ;;  %v61_v51 = vrot.slane %v47_v47, %v53_v45  ;;  %v62_v55 = vcombine.high %v54_v50, %v54_v50  ;;  %v143_v62 = vrot.slane %v54_v50, %v142_v52  ;;  %p505_p5 = scmp.ne.s32.totalorder %s359_s12, %s504_s5  ;;  %p510_p7 = scmp.lt.s32.totalorder %s504_s5, %s504_s5 }
  0x1a   :  { %408 = vmatprep.subr.mxu0 %v101_v19  ;;  %447 = vmatprep.subr.mxu1 %v101_v19  ;;  %v117_v23 = vadd.f32 %v116_v20, %v115_v17  ;;  %v89_v54 = vcombine.high %v87_v49, %v87_v49  ;;  %v183_v57 = vrot.slane %v87_v49, %v142_v52 }
  0x1b   :  { %v124_v24 = vadd.f32 %v123_v21, %v122_v18  ;;  %409 = vmatpush3.msra.mxu0 %v101_v19  ;;  %463 = vmatpush3.msra.mxu1 %v101_v19  ;;  %v63_v56 = vcombine.high %v61_v51, %v61_v51  ;;  %v187_v58 = vrot.slane %v88_v53, %v142_v52  ;;  %p511_p8 = por %p510_p7, %p509_p6 }
  0x1c   :  { %410 = vmatprep.subr.mxu0 %v100_v22  ;;  %448 = vmatprep.subr.mxu1 %v100_v22  ;;  %v126_v26 = vmul.f32 0.125, %v117_v23  ;;  %v191_v59 = vrot.slane %v89_v54, %v142_v52  ;;  %v147_v60 = vrot.slane %v61_v51, %v142_v52  ;;  %v151_v63 = vrot.slane %v62_v55, %v142_v52 }
  0x1d   :  { %v127_v27 = vmul.f32 0.125, %v124_v24  ;;  %411 = vmatpush3.msra.mxu0 %v100_v22  ;;  %464 = vmatpush3.msra.mxu1 %v100_v22  ;;  %p512_p9 = pnand %p511_p8, %p505_p5 }
  0x1e   :  { %412 = vmatprep.subr.mxu0 %v99_v25  ;;  %449 = vmatprep.subr.mxu1 %v99_v25  ;;  %v128_v29 = vsub.f32 %v108_v2, %v126_v26 }
  0x1f   :  { %413 = vmatpush3.msra.mxu0 %v99_v25  ;;  %465 = vmatpush3.msra.mxu1 %v99_v25  ;;  %v129_v31 = vsub.f32 %v583_v3, %v127_v27 }
  0x20   :  { %414 = vmatprep.subr.mxu0 %v98_v28  ;;  %450 = vmatprep.subr.mxu1 %v98_v28 }
  0x21   :  { %169 = vperm.xlu1 %482, %v128_v29   ;;  %132 = vperm.xlu0 %481, %v128_v29  }
  0x22   :  { %415 = vmatpush3.msra.mxu0 %v98_v28  ;;  %466 = vmatpush3.msra.mxu1 %v98_v28 }
  0x23   :  { %416 = vmatprep.subr.mxu0 %v97_v30  ;;  %451 = vmatprep.subr.mxu1 %v97_v30 }
  0x24   :  { %417 = vmatpush3.msra.mxu0 %v97_v30  ;;  %467 = vmatpush3.msra.mxu1 %v97_v30 }
  0x25   :  { %173 = vperm.xlu1 %482, %v129_v31   ;;  %137 = vperm.xlu0 %481, %v129_v31  }
  0x26   :  { %418 = vmatprep.subr.mxu0 %v96_v32  ;;  %452 = vmatprep.subr.mxu1 %v96_v32 }
  0x27   :  { %419 = vmatpush3.msra.mxu0 %v96_v32  ;;  %468 = vmatpush3.msra.mxu1 %v96_v32 }
  0x28   :  { %420 = vmatprep.subr.mxu0 %v95_v33  ;;  %453 = vmatprep.subr.mxu1 %v95_v33 }
  0x29   :  { %421 = vmatpush3.msra.mxu0 %v95_v33  ;;  %469 = vmatpush3.msra.mxu1 %v95_v33 }
  0x2a   :  { %422 = vmatprep.subr.mxu0 %v94_v34  ;;  %454 = vmatprep.subr.mxu1 %v94_v34 }
  0x2b   :  { %423 = vmatpush3.msra.mxu0 %v94_v34  ;;  %470 = vmatpush3.msra.mxu1 %v94_v34 }
  0x2c   :  { %424 = vmatprep.subr.mxu0 %v93_v35  ;;  %455 = vmatprep.subr.mxu1 %v93_v35 }
  0x2d   :  { %425 = vmatpush3.msra.mxu0 %v93_v35  ;;  %471 = vmatpush3.msra.mxu1 %v93_v35 }
  0x2e   :  { %426 = vmatprep.subr.mxu0 %v92_v36  ;;  %456 = vmatprep.subr.mxu1 %v92_v36 }
  0x2f   :  { %427 = vmatpush3.msra.mxu0 %v92_v36  ;;  %472 = vmatpush3.msra.mxu1 %v92_v36 }
  0x30   :  { %428 = vmatprep.subr.mxu0 %v91_v37  ;;  %457 = vmatprep.subr.mxu1 %v91_v37 }
  0x31   :  { %429 = vmatpush3.msra.mxu0 %v91_v37  ;;  %473 = vmatpush3.msra.mxu1 %v91_v37 }
  0x32   :  { %483 = vset.pattern.permute.xlu0 %v531_v0  ;;  %v155_v0 = vrot.slane %v63_v56, %v142_v52 }
  0x9c   :  { %v170_v1 = vpop.permute.xlu1 %169  ;;  %v133_v2 = vpop.permute.xlu0 %132 }
  0x9d   :  { %v197_v3 = vmul.f32 %v183_v57, %v170_v1  ;;  %v198_v4 = vmul.f32 %v187_v58, %v170_v1  ;;  %v199_v5 = vmul.f32 %v191_v59, %v170_v1  ;;  %v161_v6 = vmul.f32 %v147_v60, %v133_v2 }
  0x9e   :  { %v162_v7 = vmul.f32 %v151_v63, %v133_v2  ;;  %v163_v8 = vmul.f32 %v155_v0, %v133_v2  ;;  %v160_v9 = vmul.f32 %v143_v62, %v133_v2  ;;  %v196_v10 = vmul.f32 %v179_v61, %v170_v1 }
  0x9f   :  { %v205_v11 = vadd.f32 %v197_v3, %v161_v6 }
  0xa0   :  { %v174_v12 = vpop.permute.xlu1 %173  ;;  %v138_v13 = vpop.permute.xlu0 %137  ;;  %v204_v15 = vadd.f32 %v196_v10, %v160_v9  ;;  %v206_v16 = vadd.f32 %v198_v4, %v162_v7  ;;  %v207_v17 = vadd.f32 %v199_v5, %v163_v8 }
  0xa1   :  { %v200_v18 = vmul.f32 %v179_v61, %v174_v12  ;;  %v201_v19 = vmul.f32 %v183_v57, %v174_v12  ;;  %v202_v20 = vmul.f32 %v187_v58, %v174_v12  ;;  %v203_v21 = vmul.f32 %v191_v59, %v174_v12 }
  0xa2   :  { %v164_v22 = vmul.f32 %v143_v62, %v138_v13  ;;  %v165_v23 = vmul.f32 %v147_v60, %v138_v13  ;;  %v166_v24 = vmul.f32 %v151_v63, %v138_v13  ;;  %v167_v25 = vmul.f32 %v155_v0, %v138_v13 }
  0xa3   :  { %v218_v26 = vadd.f32 %v372_v14, %v204_v15  ;;  %v219_v27 = vadd.f32 %v372_v14, %v205_v11  ;;  %v220_v28 = vadd.f32 %v372_v14, %v206_v16  ;;  %v221_v36 = vadd.f32 %v372_v14, %v207_v17 }
  0xa4   :  { %v209_v29 = vadd.f32 %v201_v19, %v165_v23  ;;  %v210_v30 = vadd.f32 %v202_v20, %v166_v24  ;;  %v208_v31 = vadd.f32 %v200_v18, %v164_v22  ;;  %v211_v32 = vadd.f32 %v203_v21, %v167_v25 }
  0xa5   :  { %v226_v33 = vmax.f32 %v218_v26, 0.0  ;;  %v227_v34 = vmax.f32 %v219_v27, 0.0  ;;  %v228_v39 = vmax.f32 %v220_v28, 0.0  ;;  %v229_v43 = vmax.f32 %v221_v36, 0.0 }
  0xa6   :  { %v222_v35 = vadd.f32 %v372_v14, %v208_v31  ;;  %v223_v37 = vadd.f32 %v372_v14, %v209_v29  ;;  %v224_v38 = vadd.f32 %v372_v14, %v210_v30  ;;  %v225_v42 = vadd.f32 %v372_v14, %v211_v32 }
  0xa7   :  { %430 = vmatprep.mubr.f32.mxu0 %v226_v33 }
  0xa8   :  { %431 = vmatmul.mubr.f32.vlgmr.msra.gmra.mxu0 %v227_v34  ;;  %v230_v40 = vmax.f32 %v222_v35, 0.0  ;;  %v231_v41 = vmax.f32 %v223_v37, 0.0  ;;  %v232_v44 = vmax.f32 %v224_v38, 0.0  ;;  %v233_v45 = vmax.f32 %v225_v42, 0.0 }
  0xa9   :  { %433 = vmatprep.mubr.f32.mxu0 %v228_v39 }
  0xaa   :  { %436 = vmatprep.mubr.f32.mxu1 %v230_v40 }
  0xab   :  { %437 = vmatmul.mubr.f32.vlgmr.msra.gmra.mxu1 %v231_v41 }
  0xac   :  { %434 = vmatmul.mubr.f32.gmra.mxu0 %v229_v43  ;;  %439 = vmatprep.mubr.f32.mxu1 %v232_v44 }
  0xaf   :  { %440 = vmatmul.mubr.f32.gmra.mxu1 %v233_v45 }
 0x168   :  { %v432_v47 = vpop.f32.mrf.mxu0 }
 0x169   :  { %v312_v48 = vadd.f32 %v432_v47, %v373_v46 }
 0x16a   :  { %v306_v49 = vpop.f32.mrf.mxu0 }
 0x16b   :  { %346 = vst [vmem:[#allocation5 + $0x8] sm:$0xff] %v312_v48  ;;  %v307_v50 = vadd.f32 %v373_v46, %v306_v49  ;;  %v438_v51 = vpop.f32.mrf.mxu1 }
 0x16c   :  { %v435_v52 = vpop.f32.mrf.mxu0  ;;  %v332_v53 = vadd.f32 %v438_v51, %v373_v46 }
 0x16d   :  { %345 = vst [vmem:[#allocation5] sm:$0xff] %v307_v50  ;;  %v322_v54 = vadd.f32 %v435_v52, %v373_v46  ;;  %v326_v55 = vpop.f32.mrf.mxu1 }
 0x16e   :  { %350 = vst [vmem:[#allocation5 + $0x28] sm:$0xff] %v332_v53  ;;  %v316_v56 = vpop.f32.mrf.mxu0  ;;  %v327_v57 = vadd.f32 %v373_v46, %v326_v55 }
 0x16f   :  { %348 = vst [vmem:[#allocation5 + $0x18] sm:$0xff] %v322_v54  ;;  %v317_v58 = vadd.f32 %v373_v46, %v316_v56  ;;  %v441_v59 = vpop.f32.mrf.mxu1 }
 0x170   :  { %349 = vst [vmem:[#allocation5 + $0x20] sm:$0xff] %v327_v57  ;;  %v342_v60 = vadd.f32 %v441_v59, %v373_v46 }
 0x171   :  { %347 = vst [vmem:[#allocation5 + $0x10] sm:$0xff] %v317_v58  ;;  %v336_v61 = vpop.f32.mrf.mxu1 }
 0x172   :  { %352 = vst [vmem:[#allocation5 + $0x38] sm:$0xff] %v342_v60  ;;  %v337_v62 = vadd.f32 %v373_v46, %v336_v61 }
 0x174   :  { %351 = vst [vmem:[#allocation5 + $0x30] sm:$0xff] %v337_v62 }
 0x175   :  { %515 = shalt.err (!%p512_p9)
}
 0x176   :  { %364 = dma.vmem_to_hbm [thread:$0]  %s359_s12, 1024, %s612_s6, [#allocation4], %s529_s24, %s529_s24, %s530_s25  }
 0x177   :  { %526 = dma.done.wait [#allocation4], 1024  }
 0x178   :  { %527 = vsyncadd [#allocation4], 4294966272 }
 0x179   :  { %368 = vsyncpa [#allocation3], 1 }
 0x17a   :  { %369 = vsyncpa [#allocation4], 1 }

</bundles_post_ra>
